<compile_context>
chip_gen: v7x
topology: tpu7x:2x2x1
jax: 0.10.0
libtpu: 0.0.40
codegen_flags: <defaults>
</compile_context>

<pallas_src>
import functools
import numpy as np
import jax
import jax.numpy as jnp
from jax.experimental import pallas as pl
from jax.experimental.pallas import tpu as pltpu


def _ceil_to(x, m):
    return ((x + m - 1) // m) * m


# ----------------------------- Pallas kernels ------------------------------

def _gemm_kernel(a_ref, b_ref, s_ref, c_ref, *refs, relu, has_res):
    """Tiled GEMM. bf16 MXU operands, f32 accumulation directly in o_ref.

    Epilogue (last k step): y = acc * scale + bias (+ residual) (+ ReLU).
    """
    if has_res:
        r_ref, o_ref = refs
    else:
        (o_ref,) = refs

    k = pl.program_id(2)

    @pl.when(k == 0)
    def _():
        o_ref[...] = jnp.zeros_like(o_ref)

    o_ref[...] += jnp.dot(a_ref[...].astype(jnp.bfloat16),
                          b_ref[...].astype(jnp.bfloat16),
                          preferred_element_type=jnp.float32)

    @pl.when(k == pl.num_programs(2) - 1)
    def _():
        y = o_ref[...] * s_ref[...] + c_ref[...]
        if has_res:
            y = y + r_ref[...]
        if relu:
            y = jnp.maximum(y, 0.0)
        o_ref[...] = y


def matmul_scale_bias_act(a, b, scale, bias, relu, res=None):
    """relu?((a @ b) * scale + bias (+ res)).

    a: [M, K] (f32 or bf16), b: [K, N] (bf16 weights), scale/bias: [N] f32,
    res: optional [M, N] f32 fused residual.  Returns f32 [M, N].
    """
    M, K = a.shape
    _, N = b.shape

    # Tile heuristics: large lane-dense N/K tiles (MXU friendly, amortize
    # per-grid-step overhead), pad-aware K so we don't burn MXU cycles on
    # zero padding, modest M tiles since M collapses in the deep layers.
    tm = min(256, _ceil_to(M, 8))
    tn = min(512, _ceil_to(N, 128))
    Kp = _ceil_to(K, 128)
    if Kp <= 1024:
        tk = Kp                                   # single K step, no waste
    else:
        tk = max(t for t in (512, 384, 256, 128) if Kp % t == 0)
    Mp, Np = _ceil_to(M, tm), _ceil_to(N, tn)

    a_p = jnp.pad(a, ((0, Mp - M), (0, Kp - K)))
    b_p = jnp.pad(b, ((0, Kp - K), (0, Np - N)))
    s_p = jnp.pad(scale, (0, Np - N)).reshape(1, Np)
    c_p = jnp.pad(bias, (0, Np - N)).reshape(1, Np)

    inputs = [a_p, b_p, s_p, c_p]
    in_specs = [
        pl.BlockSpec((tm, tk), lambda i, j, k: (i, k)),
        pl.BlockSpec((tk, tn), lambda i, j, k: (k, j)),
        pl.BlockSpec((1, tn), lambda i, j, k: (0, j)),
        pl.BlockSpec((1, tn), lambda i, j, k: (0, j)),
    ]
    has_res = res is not None
    if has_res:
        r_p = jnp.pad(res, ((0, Mp - M), (0, Np - N)))
        inputs.append(r_p)
        in_specs.append(pl.BlockSpec((tm, tn), lambda i, j, k: (i, j)))

    grid = (Mp // tm, Np // tn, Kp // tk)
    out = pl.pallas_call(
        functools.partial(_gemm_kernel, relu=relu, has_res=has_res),
        out_shape=jax.ShapeDtypeStruct((Mp, Np), jnp.float32),
        grid_spec=pltpu.PrefetchScalarGridSpec(
            num_scalar_prefetch=0,
            grid=grid,
            in_specs=in_specs,
            out_specs=pl.BlockSpec((tm, tn), lambda i, j, k: (i, j)),
        ),
        compiler_params=pltpu.CompilerParams(
            dimension_semantics=("parallel", "parallel", "arbitrary"),
            vmem_limit_bytes=48 * 1024 * 1024),
    )(*inputs)
    return out[:M, :N]


def _max9_kernel(p_ref, o_ref):
    # p_ref: [9, rows, C] window patches; reduce max over the 9 taps.
    o_ref[...] = jnp.max(p_ref[...], axis=0)


def _avgpool_kernel(x_ref, o_ref, *, inv_hw):
    # x_ref: [N, H*W, tc]; mean over spatial axis.
    o_ref[...] = jnp.sum(x_ref[...], axis=1) * inv_hw


# ------------------------------- JAX glue ----------------------------------

def im2col(x, kh, kw, stride, pad):
    """x: NHWC -> col [N*Ho*Wo, kh*kw*C] (tap-major, channel-minor)."""
    N, H, W, C = x.shape
    if pad:
        x = jnp.pad(x, ((0, 0), (pad, pad), (pad, pad), (0, 0)))
    Ho = (H + 2 * pad - kh) // stride + 1
    Wo = (W + 2 * pad - kw) // stride + 1
    cols = []
    for i in range(kh):
        for j in range(kw):
            cols.append(x[:, i:i + stride * (Ho - 1) + 1:stride,
                          j:j + stride * (Wo - 1) + 1:stride, :])
    col = jnp.stack(cols, axis=3)                       # [N,Ho,Wo,kh*kw,C]
    return col.reshape(N * Ho * Wo, kh * kw * C), N, Ho, Wo


def conv_bn(x_nhwc, p, stride, pad, relu, res=None):
    """Convolution + folded BN (+ fused residual) (+ ReLU) via Pallas GEMM."""
    wm, scale, bias, k = p["wm"], p["scale"], p["bias"], p["k"]
    if k == 1:
        # 1x1 conv: no im2col needed, just (optionally strided) reshape.
        if stride > 1:
            x_nhwc = x_nhwc[:, ::stride, ::stride, :]
        N, Ho, Wo, C = x_nhwc.shape
        col = x_nhwc.reshape(N * Ho * Wo, C)
    else:
        # TODO(synk): the 3x3/7x7 im2col matrix is still materialized in HBM
        # (in bf16 to halve its traffic); an in-kernel tap expansion would
        # remove it entirely.
        col, N, Ho, Wo = im2col(x_nhwc.astype(jnp.bfloat16), k, k, stride, pad)
    y = matmul_scale_bias_act(col, wm, scale, bias, relu, res=res)
    return y.reshape(N, Ho, Wo, wm.shape[1])


def maxpool_3x3_s2_p1(x):
    N, H, W, C = x.shape
    xp = jnp.pad(x, ((0, 0), (1, 1), (1, 1), (0, 0)), constant_values=-1e30)
    Ho = (H + 2 - 3) // 2 + 1
    Wo = (W + 2 - 3) // 2 + 1
    pats = []
    for i in range(3):
        for j in range(3):
            pats.append(xp[:, i:i + 2 * (Ho - 1) + 1:2,
                           j:j + 2 * (Wo - 1) + 1:2, :])
    M = N * Ho * Wo
    p = jnp.stack(pats, axis=0).reshape(9, M, C)
    tr = min(512, _ceil_to(M, 8))
    Mp = _ceil_to(M, tr)
    if Mp != M:
        p = jnp.pad(p, ((0, 0), (0, Mp - M), (0, 0)), constant_values=-1e30)
    out = pl.pallas_call(
        _max9_kernel,
        out_shape=jax.ShapeDtypeStruct((Mp, C), x.dtype),
        grid_spec=pltpu.PrefetchScalarGridSpec(
            num_scalar_prefetch=0,
            grid=(Mp // tr,),
            in_specs=[pl.BlockSpec((9, tr, C), lambda i: (0, i, 0))],
            out_specs=pl.BlockSpec((tr, C), lambda i: (i, 0)),
        ),
        compiler_params=pltpu.CompilerParams(dimension_semantics=("parallel",)),
    )(p)
    return out[:M].reshape(N, Ho, Wo, C)


def global_avg_pool(x):
    N, H, W, C = x.shape
    xr = x.reshape(N, H * W, C)
    tc = 512 if C % 512 == 0 else C
    return pl.pallas_call(
        functools.partial(_avgpool_kernel, inv_hw=1.0 / (H * W)),
        out_shape=jax.ShapeDtypeStruct((N, C), x.dtype),
        grid_spec=pltpu.PrefetchScalarGridSpec(
            num_scalar_prefetch=0,
            grid=(C // tc,),
            in_specs=[pl.BlockSpec((N, H * W, tc), lambda c: (0, 0, c))],
            out_specs=pl.BlockSpec((N, tc), lambda c: (0, c)),
        ),
        compiler_params=pltpu.CompilerParams(dimension_semantics=("parallel",)),
    )(xr)


def bottleneck(x, p):
    out = conv_bn(x, p["c1"], 1, 0, True)                     # 1x1 + BN + ReLU
    out = conv_bn(out, p["c2"], p["stride"], 1, True)         # 3x3 + BN + ReLU
    if "down" in p:
        identity = conv_bn(x, p["down"], p["stride"], 0, False)
    else:
        identity = x
    Ni, Hi, Wi, Ci = identity.shape
    res = identity.reshape(Ni * Hi * Wi, Ci)
    # 1x1 + BN with the residual add + ReLU fused into the GEMM epilogue.
    out = conv_bn(out, p["c3"], 1, 0, True, res=res)
    return out


def forward(x_nchw, params):
    x = jnp.transpose(x_nchw, (0, 2, 3, 1))                   # NCHW -> NHWC
    x = conv_bn(x, params["stem"], 2, 3, True)                # conv1 7x7/2 + BN + ReLU
    x = maxpool_3x3_s2_p1(x)                                  # maxpool 3x3/2
    for blk in params["blocks"]:                              # layers 1..4
        x = bottleneck(x, blk)
    feat = global_avg_pool(x)                                 # [N, 2048]
    # Both heads fused into one GEMM, then split.
    ones = jnp.ones((params["head_w"].shape[1],), jnp.float32)
    heads = matmul_scale_bias_act(feat, params["head_w"], ones,
                                  params["head_b"], relu=False)
    value = heads[:, :1]                                      # [N, 1]
    unit = heads[:, 1:]                                       # [N, num_units]
    return value, unit


# ------------------------- deterministic parameters -------------------------

def make_params(key, num_units):
    keys = iter(jax.random.split(key, 256))

    def conv_bn_p(cin, cout, k):
        w = jax.random.normal(next(keys), (cout, cin, k, k),
                              jnp.float32) / np.sqrt(cin * k * k)
        gamma = 1.0 + 0.05 * jax.random.normal(next(keys), (cout,), jnp.float32)
        beta = 0.05 * jax.random.normal(next(keys), (cout,), jnp.float32)
        mean = jnp.zeros((cout,), jnp.float32)
        var = jnp.ones((cout,), jnp.float32)
        scale = gamma / jnp.sqrt(var + 1e-5)                  # folded eval-mode BN
        bias = beta - mean * scale
        # Pre-reshape weights to the GEMM layout and store in bf16 (MXU dtype).
        wm = jnp.transpose(w, (2, 3, 1, 0)).reshape(k * k * cin,
                                                    cout).astype(jnp.bfloat16)
        return dict(wm=wm, scale=scale, bias=bias, k=k)

    params = {"stem": conv_bn_p(3, 64, 7)}
    blocks = []
    inplanes = 64
    for planes, n_blocks, stride in [(64, 3, 1), (128, 4, 2),
                                     (256, 6, 2), (512, 3, 2)]:
        for bi in range(n_blocks):
            s = stride if bi == 0 else 1
            blk = {
                "stride": s,
                "c1": conv_bn_p(inplanes, planes, 1),
                "c2": conv_bn_p(planes, planes, 3),
                "c3": conv_bn_p(planes, planes * 4, 1),
            }
            if bi == 0:                                       # downsample path
                blk["down"] = conv_bn_p(inplanes, planes * 4, 1)
            blocks.append(blk)
            inplanes = planes * 4
    params["blocks"] = blocks
    reg_w = jax.random.normal(next(keys), (1, 2048),
                              jnp.float32) / np.sqrt(2048.0)
    reg_b = jnp.zeros((1,), jnp.float32)
    cls_w = jax.random.normal(next(keys), (num_units, 2048),
                              jnp.float32) / np.sqrt(2048.0)
    cls_b = jnp.zeros((num_units,), jnp.float32)
    # Fuse both heads into a single [2048, 1+num_units] GEMM weight.
    params["head_w"] = jnp.concatenate([reg_w, cls_w], axis=0).T.astype(jnp.bfloat16)
    params["head_b"] = jnp.concatenate([reg_b, cls_b], axis=0)
    return params


if __name__ == "__main__":
    num_units = 10
    key = jax.random.PRNGKey(0)
    pkey, xkey = jax.random.split(key)
    params = make_params(pkey, num_units)
    x = jax.random.normal(xkey, (2, 3, 32, 32), jnp.float32)   # NCHW like PyTorch
    value, unit = forward(x, params)
    jax.block_until_ready((value, unit))
    assert value.shape == (2, 1), value.shape
    assert unit.shape == (2, num_units), unit.shape
    assert bool(jnp.all(jnp.isfinite(value))) and bool(jnp.all(jnp.isfinite(unit)))
    print("KERNEL_OK")
</pallas_src>

<mosaic_0001>
module attributes {stable_mosaic.version = 11 : i64} {
  func.func @_gemm_kernel(%arg0: i32, %arg1: i32, %arg2: i32, %arg3: memref<256x256xbf16, #tpu.memory_space<vmem>>, %arg4: memref<256x128xbf16, #tpu.memory_space<vmem>>, %arg5: memref<1x128xf32, #tpu.memory_space<vmem>>, %arg6: memref<1x128xf32, #tpu.memory_space<vmem>>, %arg7: memref<256x128xf32, #tpu.memory_space<vmem>>) attributes {dimension_semantics = [#tpu.dimension_semantics<parallel>, #tpu.dimension_semantics<parallel>, #tpu.dimension_semantics<arbitrary>], iteration_bounds = array<i64: 2, 1, 1>, scalar_prefetch = 0 : i64, scratch_operands = 0 : i64, tpu.core_type = #tpu.core_type<tc>, window_params = [{transform_indices = @transform_0, window_bounds = array<i64: 256, 256>}, {transform_indices = @transform_1, window_bounds = array<i64: 256, 128>}, {transform_indices = @transform_2, window_bounds = array<i64: 1, 128>}, {transform_indices = @transform_3, window_bounds = array<i64: 1, 128>}, {transform_indices = @transform_4, window_bounds = array<i64: 256, 128>}]} {
    %c0_i32 = arith.constant 0 : i32
    %0 = arith.cmpi eq, %arg2, %c0_i32 : i32
    %1 = arith.extui %0 : i1 to i32
    %c0_i32_0 = arith.constant 0 : i32
    %2 = arith.cmpi ne, %1, %c0_i32_0 : i32
    scf.if %2 {
      %cst_10 = arith.constant 0.000000e+00 : f32
      %12 = vector.broadcast %cst_10 : f32 to vector<256x128xf32>
      %c0_11 = arith.constant 0 : index
      %c0_12 = arith.constant 0 : index
      %13 = vector.load %arg7[%c0_11, %c0_12] : memref<256x128xf32, #tpu.memory_space<vmem>>, vector<256x128xf32>
      tpu.vector_store %arg7[%c0_11, %c0_12], %12 {strides = array<i32>} : memref<256x128xf32, #tpu.memory_space<vmem>>, vector<256x128xf32>,
    } else {
    }
    %c0 = arith.constant 0 : index
    %c0_1 = arith.constant 0 : index
    %3 = vector.load %arg7[%c0, %c0_1] : memref<256x128xf32, #tpu.memory_space<vmem>>, vector<256x128xf32>
    %c0_2 = arith.constant 0 : index
    %c0_3 = arith.constant 0 : index
    %4 = vector.load %arg3[%c0_2, %c0_3] : memref<256x256xbf16, #tpu.memory_space<vmem>>, vector<256x256xbf16>
    %c0_4 = arith.constant 0 : index
    %c0_5 = arith.constant 0 : index
    %5 = vector.load %arg4[%c0_4, %c0_5] : memref<256x128xbf16, #tpu.memory_space<vmem>>, vector<256x128xbf16>
    %cst = arith.constant dense<0.000000e+00> : vector<256x128xf32>
    %6 = tpu.matmul %4, %5, %cst {dimension_numbers = #tpu.dot_dimension_numbers<[1], [0], [0], [1], [0, 0, 1, 1], [], []>} : vector<256x256xbf16>, vector<256x128xbf16>, vector<256x128xf32> -> vector<256x128xf32>
    %7 = arith.addf %3, %6 : vector<256x128xf32>
    %c0_6 = arith.constant 0 : index
    %c0_7 = arith.constant 0 : index
    %8 = vector.load %arg7[%c0_6, %c0_7] : memref<256x128xf32, #tpu.memory_space<vmem>>, vector<256x128xf32>
    tpu.vector_store %arg7[%c0_6, %c0_7], %7 {strides = array<i32>} : memref<256x128xf32, #tpu.memory_space<vmem>>, vector<256x128xf32>,
    %c0_i32_8 = arith.constant 0 : i32
    %9 = arith.cmpi eq, %arg2, %c0_i32_8 : i32
    %10 = arith.extui %9 : i1 to i32
    %c0_i32_9 = arith.constant 0 : i32
    %11 = arith.cmpi ne, %10, %c0_i32_9 : i32
    scf.if %11 {
      %c0_10 = arith.constant 0 : index
      %c0_11 = arith.constant 0 : index
      %12 = vector.load %arg7[%c0_10, %c0_11] : memref<256x128xf32, #tpu.memory_space<vmem>>, vector<256x128xf32>
      %c0_12 = arith.constant 0 : index
      %c0_13 = arith.constant 0 : index
      %13 = vector.load %arg5[%c0_12, %c0_13] : memref<1x128xf32, #tpu.memory_space<vmem>>, vector<1x128xf32>
      %14 = vector.broadcast %13 : vector<1x128xf32> to vector<256x128xf32>
      %15 = arith.mulf %12, %14 : vector<256x128xf32>
      %c0_14 = arith.constant 0 : index
      %c0_15 = arith.constant 0 : index
      %16 = vector.load %arg6[%c0_14, %c0_15] : memref<1x128xf32, #tpu.memory_space<vmem>>, vector<1x128xf32>
      %17 = vector.broadcast %16 : vector<1x128xf32> to vector<256x128xf32>
      %18 = arith.addf %15, %17 : vector<256x128xf32>
      %cst_16 = arith.constant 0.000000e+00 : f32
      %19 = vector.broadcast %cst_16 : f32 to vector<256x128xf32>
      %20 = arith.maximumf %18, %19 : vector<256x128xf32>
      %c0_17 = arith.constant 0 : index
      %c0_18 = arith.constant 0 : index
      %21 = vector.load %arg7[%c0_17, %c0_18] : memref<256x128xf32, #tpu.memory_space<vmem>>, vector<256x128xf32>
      tpu.vector_store %arg7[%c0_17, %c0_18], %20 {strides = array<i32>} : memref<256x128xf32, #tpu.memory_space<vmem>>, vector<256x128xf32>,
    } else {
    }
    return
  }
  func.func @transform_0(%arg0: i32, %arg1: i32, %arg2: i32) -> (i32, i32) {
    %c0_i32 = arith.constant 0 : i32
    return %arg0, %arg2 : i32, i32
  }
  func.func @transform_1(%arg0: i32, %arg1: i32, %arg2: i32) -> (i32, i32) {
    %c0_i32 = arith.constant 0 : i32
    return %arg2, %arg1 : i32, i32
  }
  func.func @transform_2(%arg0: i32, %arg1: i32, %arg2: i32) -> (i32, i32) {
    %c0_i32 = arith.constant 0 : i32
    %c0_i32_0 = arith.constant 0 : i32
    return %c0_i32, %arg1 : i32, i32
  }
  func.func @transform_3(%arg0: i32, %arg1: i32, %arg2: i32) -> (i32, i32) {
    %c0_i32 = arith.constant 0 : i32
    %c0_i32_0 = arith.constant 0 : i32
    return %c0_i32, %arg1 : i32, i32
  }
  func.func @transform_4(%arg0: i32, %arg1: i32, %arg2: i32) -> (i32, i32) {
    %c0_i32 = arith.constant 0 : i32
    return %arg0, %arg1 : i32, i32
  }
}

</mosaic_0001>

<bundles_post_ra>
// kernel: tpu_custom_call.1
= control target key start
LH: loop header
LB: loop body
LE: loop exit
PB: predicated region body
PF: predicated region fallthrough
CT: control target
= control target key end

     0   :  { %9 = vsyncpa [#allocation3], 0  ;;  %s2124_s0 = inlined_call_operand.hbm [shape: bf16[512,256], index: 0, kind: input, shape index: {}]   ;;  %s2125_s1 = inlined_call_operand.hbm [shape: bf16[256,128], index: 1, kind: input, shape index: {}]   ;;  %s2126_s2 = inlined_call_operand.vmem [shape: f32[1,128], index: 2, kind: input, shape index: {}]   ;;  %s2127_s3 = inlined_call_operand.vmem [shape: f32[1,128], index: 3, kind: input, shape index: {}]   ;;  %s2128_s4 = inlined_call_operand.hbm [shape: f32[512,128], index: 4, kind: output, shape index: {}]  }
   0x1   :  { %11 = vsyncpa [#allocation3 + $0x1], 0 }
   0x2   :  { %12 = vsyncpa [#allocation6], 0 }
   0x3   :  { %13 = vsyncpa [#allocation4], 0 }
   0x4   :  { %15 = vsyncpa [#allocation4 + $0x1], 0  ;;  %s1758_s15 = smov 0   ;;  %s1760_s16 = smov 0  }
   0x5   :  { %s1762_s17 = smov 0   ;;  %s1764_s18 = smov 0  }
   0x6   :  { %s1766_s19 = smov 0   ;;  %s1768_s20 = smov 0  }
   0x7 LB: > { %s1233_s21 = sadd.s32 4294967295, %s1722_s20   ;;  %s1234_s22 = sadd.s32 4294967294, %s1722_s20   ;;  %s1722_s20 = sphi %s1768_s20, %s21_s20   ;;  %s1718_s19 = sphi %s1766_s19, %s2152_s19   ;;  %s1714_s18 = sphi %s1764_s18, %s2151_s18   ;;  %s1710_s17 = sphi %s1762_s17, %s2150_s17   ;;  %s1706_s16 = sphi %s1760_s16, %s2149_s16   ;;  %s1702_s15 = sphi %s1758_s15, %s2148_s15  }
   0x8   : > { %p62_p0 = scmp.ne.s32.totalorder %s1706_s16, %s1702_s15  ;;  %p1792_p1 = scmp.eq.s32.totalorder %s1233_s21, 0 }
   0x9   : > { %p1796_p2 = scmp.eq.s32.totalorder %s1233_s21, 1  ;;  %p174_p3 = scmp.eq.s32.totalorder %s1234_s22, 1 }
   0xa   : > { %s2133_s23 = scalar_select %p1792_p1, 1, 0 }
   0xb   : > { %s2134_s24 = scalar_select %p1796_p2, 1, 0 }
   0xc   : > { %p1802_p4 = por %p1792_p1, %p62_p0  ;;  %p1235_p5 = scmp.ge.s32.totalorder %s1722_s20, 1 }
   0xd   : > { %p1807_p6 = por %p174_p3, %p62_p0  ;;  %p181_p7 = scmp.lt.s32.totalorder %s1722_s20, 3 }
   0xe   : > { %s2135_s25 = scalar_select %p1802_p4, 1, 0 }
   0xf   : > { %s2136_s26 = scalar_select %p1807_p6, 1, 0 }
  0x10   : > { %p1812_p8 = pnand %p1235_p5, %p181_p7  ;;  %s1724_s28 = smov [#allocation5]  }
  0x11   : > { %s197_s29 = sshll.u32 %s1724_s28, 4  ;;  %s40_s5 = sadd.s32 1, %s1718_s19  ;;  %s198_s29 = int_to_ptr.vmem [resolvable:$true] %s197_s29 }
  0x12   : > { %s2137_s27 = scalar_select %p1812_p8, 1, 0 }
  0x13   : > { %p1442_p9 = pneg %p1812_p8  ;;  %s1578_s8 = scalar_lea.hbm %s2125_s1, 2048 }
  0x14   : > { %p1579_p12 = scmp.ne.s32.totalorder %s2125_s1, %s1578_s8  ;;  %p1585_p5 = scmp.lt.u32.totalorder %s1578_s8, %s2125_s1 }
  0x15   : > { %p1821_p11 = pnand %p1442_p9, %p1792_p1 }
  0x17   : > { %p1580_p13 = pneg %p1821_p11 }
  0x19   : > { %p1581_p0 = pnand %p1580_p13, %p1579_p12 }
  0x1b   : > { %p1582_p3 = pneg %p1581_p0 }
  0x1d   : > { %p1587_p7 = pnand %p1585_p5, %p1582_p3 }
  0x1f   : > { %1590 = shalt.err (!%p1587_p7)
}
  0x20   : > { %s1591_s13 = scalar_lea.vmem %s198_s29, 2048  ;;  %p1599_p1 = scmp.lt.s32.totalorder %s198_s29, %s198_s29 }
  0x21   : > { %p1592_p9 = scmp.ne.s32.totalorder %s198_s29, %s1591_s13  ;;  %p1600_p4 = scmp.lt.s32.totalorder %s1591_s13, %s1591_s13 }
  0x23   : > { %p1594_p10 = pnand %p1592_p9, %p1580_p13  ;;  %p1601_p8 = por %p1600_p4, %p1599_p1 }
  0x25   : > { %p1595_p6 = pneg %p1594_p10 }
  0x27   : > { %p1602_p2 = pnand %p1601_p8, %p1595_p6 }
  0x29   : > { %1605 = shalt.err (!%p1602_p2)
}
  0x2a   : > { %s1725_s14 = smov 64   ;;  %s1726_s21 = smov 4  }
  0x2b   : > { %1445 = dma.hbm_to_vmem [thread:$0]  (!%p1821_p11), %s2125_s1, 2048, %s198_s29, [#allocation6], %s1725_s14, %s1725_s14, %s1726_s21  }
  0x2c   : > { %p42_p1 = scmp.ge.s32.totalorder %s40_s5, 2  ;;  %s49_s6 = sadd.s32 1, %s1710_s17 }
  0x2d   : > { %p56_p2 = scmp.ne.s32.totalorder %s1710_s17, %s1706_s16  ;;  %p57_p4 = scmp.eq.s32.totalorder %s1722_s20, 0 }
  0x2e   : > { %s2154_s5 = smov (%p42_p1, %s40_s5), 0  ;;  %p2140_p8 = scmp.ne.s32.totalorder %s2134_s24, 0 }
  0x2f   : > { %p1848_p6 = por %p57_p4, %p56_p2  ;;  %s44_s30 = ssub.s32 %s1718_s19, %s2154_s5 }
  0x30   : > { %p1854_p10 = por %p2140_p8, %p56_p2  ;;  %p1455_p12 = scmp.lt.s32.totalorder %s1722_s20, 2 }
  0x31   : > { %p47_p11 = scmp.eq.s32.totalorder %s44_s30, 0  ;;  %s223_s29 = sand.u32 1, %s1710_s17  }
  0x32   : > { %s1240_s9 = sshll.u32 %s223_s29, 8  ;;  %s1304_s11 = sshll.u32 %s1718_s19, 12 }
  0x33   : > { %s1863_s10 = scalar_select %p47_p11, %s1710_s17, %s49_s6  }
  0x34   : > { %s1869_s14 = scalar_lea.hbm %s2124_s0, %s1304_s11  ;;  %s227_s24 = scalar_lea.vmem [#allocation2], %s1240_s9 }
  0x35   : > { %s237_s21 = sshll.u32 %s227_s24, 4  ;;  %p1875_p13 = pnand %p1455_p12, %p1848_p6  ;;  %s1871_s21 = int_to_ptr.vmem [resolvable:$true] %s237_s21 }
  0x36   : > { %s1879_s28 = scalar_lea.sflag [#allocation3], %s223_s29  ;;  %s1606_s6 = scalar_lea.hbm %s1869_s14, 4096 }
  0x37   : > { %p1607_p0 = scmp.ne.s32.totalorder %s1869_s14, %s1606_s6  ;;  %p1608_p3 = pneg %p1875_p13 }
  0x38   : > { %s1611_s7 = scalar_lea.hbm %s2124_s0, 8192  ;;  %p1612_p9 = scmp.lt.u32.totalorder %s1869_s14, %s2124_s0 }
  0x39   : > { %p1609_p5 = pnand %p1608_p3, %p1607_p0  ;;  %p1613_p1 = scmp.lt.u32.totalorder %s1611_s7, %s1606_s6 }
  0x3a   : > { %p1615_p4 = scmp.lt.u32.totalorder %s1606_s6, %s1869_s14 }
  0x3b   : > { %p1610_p7 = pneg %p1609_p5  ;;  %p1614_p2 = por %p1613_p1, %p1612_p9 }
  0x3d   : > { %p1616_p6 = por %p1615_p4, %p1614_p2 }
  0x3f   : > { %p1617_p8 = pnand %p1616_p6, %p1610_p7 }
  0x41   : > { %1620 = shalt.err (!%p1617_p8)
}
  0x42   : > { %s1621_s29 = scalar_lea.vmem %s1871_s21, 4096  ;;  %s1727_s13 = smov [#allocation2]  }
  0x43   : > { %p1622_p12 = scmp.ne.s32.totalorder %s1871_s21, %s1621_s29  ;;  %s1626_s24 = sshll.u32 %s1727_s13, 4  ;;  %s1627_s24 = int_to_ptr.vmem [resolvable:$false] %s1626_s24 }
  0x44   : > { %s1628_s30 = scalar_lea.vmem %s1627_s24, 8192  ;;  %p1629_p5 = scmp.lt.s32.totalorder %s1871_s21, %s1627_s24 }
  0x45   : > { %p1624_p11 = pnand %p1622_p12, %p1608_p3  ;;  %p1630_p9 = scmp.lt.s32.totalorder %s1628_s30, %s1621_s29 }
  0x47   : > { %p1625_p0 = pneg %p1624_p11  ;;  %p1631_p1 = por %p1630_p9, %p1629_p5 }
  0x49   : > { %p1632_p2 = pnand %p1631_p1, %p1625_p0 }
  0x4b   : > { %1635 = shalt.err (!%p1632_p2)
}
  0x4c   : > { %s1728_s6 = smov 128   ;;  %s1729_s9 = smov 8  }
  0x4d   : > { %1449 = dma.hbm_to_vmem [thread:$0]  (!%p1875_p13), %s1869_s14, 4096, %s1871_s21, %s1879_s28, %s1728_s6, %s1728_s6, %s1729_s9  }
  0x4e   : > { %p2143_p3 = scmp.ne.s32.totalorder %s2137_s27, 0 }
  0x4f   : > { %s1910_s7 = sand.u32 (!%p2143_p3), 1, %s1706_s16   ;;  %p2144_p7 = scmp.ne.s32.totalorder (!%p2143_p3), %s2135_s25, 0 }
  0x50   : > { %249 = sbr.rel (%p2143_p3) target bundleno = 418 (0x1a2), region = 36  ;;  %s1245_s11 = sshll.u32 (!%p2143_p3), %s1910_s7, 8 }
  0x51   : > { %s252_s12 = scalar_lea.sflag (!%p2143_p3), [#allocation3], %s1910_s7  ;;  %s1916_s29 = scalar_lea.vmem (!%p2143_p3), [#allocation2], %s1245_s11 }
  0x57   : > { %1689 = dma.done.wait (%p2144_p7), %s252_s12, 4096  }
  0x58   : > { %1691 = vsyncadd (%p2144_p7), %s252_s12, 4294963200  ;;  %p2145_p13 = scmp.ne.s32.totalorder %s2133_s23, 0 }
  0x5a   : > { %1693 = dma.done.wait (%p2145_p13), [#allocation6], 2048  }
  0x5b   : > { %1695 = vsyncadd (%p2145_p13), [#allocation6], 4294965248  ;;  %v1514_v0 = vld [vmem:[#allocation5 + $0x40] sm:$0xff]   ;;  %v1516_v2 = vld [vmem:[#allocation5 + $0x48] sm:$0xff]   ;;  %s1978_s21 = scalar_lea.vmem [#allocation7], %s1245_s11  ;;  %s1305_s22 = sshll.u32 %s1714_s18, 12 }
  0x5c   : > { %v1515_v1 = vld [vmem:[#allocation5] sm:$0xff]   ;;  %1306 = vmatprep.subr.bf16.mxu0 %v1514_v0  ;;  %1418 = vmatprep.subr.bf16.mxu1 %v1514_v0  ;;  %v1517_v3 = vld [vmem:[#allocation5 + $0x8] sm:$0xff]   ;;  %v1518_v4 = vld [vmem:[#allocation5 + $0x50] sm:$0xff]   ;;  %s1106_s28 = sshll.u32 %s1978_s21, 4  ;;  %s2069_s30 = scalar_lea.hbm %s2128_s4, %s1305_s22  ;;  %s2071_s28 = int_to_ptr.vmem [resolvable:$true] %s1106_s28 }
  0x5d   : > { %1307 = vmatpush3.bf16.msra.mxu0 %v1515_v1  ;;  %1426 = vmatpush3.bf16.msra.mxu1 %v1515_v1  ;;  %v1519_v5 = vld [vmem:[#allocation5 + $0x10] sm:$0xff]   ;;  %v1520_v6 = vld [vmem:[#allocation5 + $0x58] sm:$0xff]   ;;  %v1522_v8 = vld [vmem:[#allocation5 + $0x60] sm:$0xff]   ;;  %s1092_s18 = scalar_lea.sflag [#allocation4], %s1910_s7  ;;  %s1636_s6 = scalar_lea.vmem %s2071_s28, 4096 }
  0x5e   : > { %1308 = vmatprep.subr.bf16.mxu0 %v1516_v2  ;;  %1419 = vmatprep.subr.bf16.mxu1 %v1516_v2  ;;  %v1521_v7 = vld [vmem:[#allocation5 + $0x18] sm:$0xff]   ;;  %v1523_v9 = vld [vmem:[#allocation5 + $0x20] sm:$0xff]   ;;  %v1524_v10 = vld [vmem:[#allocation5 + $0x68] sm:$0xff]   ;;  %p1637_p4 = scmp.ne.s32.totalorder %s2071_s28, %s1636_s6  ;;  %s1730_s9 = smov [#allocation7]  }
  0x5f   : > { %v1532_v11 = vld [vmem:[%s1916_s29 + $0x4] ss:$8 sps:$4 sm:$0xff]   ;;  %v1526_v14 = vld [vmem:[#allocation5 + $0x70] sm:$0xff]   ;;  %v1528_v16 = vld [vmem:[#allocation5 + $0x78] sm:$0xff]   ;;  %s1640_s11 = sshll.u32 %s1730_s9, 4  ;;  %s1641_s11 = int_to_ptr.vmem [resolvable:$false] %s1640_s11 }
  0x60   : > { %v1535_v12 = vld [vmem:[%s1916_s29 + $0x84] ss:$8 sps:$4 sm:$0xff]   ;;  %721 = vmatprep.mubr.bf16.mxu0 %v1532_v11  ;;  %v1527_v15 = vld [vmem:[#allocation5 + $0x30] sm:$0xff]   ;;  %v1529_v17 = vld [vmem:[#allocation5 + $0x38] sm:$0xff]   ;;  %p1638_p6 = pnand %p1637_p4, %p1854_p10  ;;  %s1642_s12 = scalar_lea.vmem %s1641_s11, 8192 }
  0x61   : > { %1309 = vmatpush3.bf16.msra.mxu0 %v1517_v3  ;;  %1427 = vmatpush3.bf16.msra.mxu1 %v1517_v3  ;;  %v1525_v13 = vld [vmem:[#allocation5 + $0x28] sm:$0xff]   ;;  %v1536_v20 = vld [vmem:[%s1916_s29 + $0x14] ss:$8 sps:$4 sm:$0xff]   ;;  %v1540_v22 = vld [vmem:[%s1916_s29 + $0x10] ss:$8 sps:$4 sm:$0xff]   ;;  %p1643_p12 = scmp.lt.s32.totalorder %s2071_s28, %s1641_s11  ;;  %p1644_p11 = scmp.lt.s32.totalorder %s1642_s12, %s1636_s6 }
  0x62   : > { %1310 = vmatprep.subr.bf16.mxu0 %v1518_v4  ;;  %1420 = vmatprep.subr.bf16.mxu1 %v1518_v4  ;;  %v1530_v18 = vld [vmem:[%s1916_s29] ss:$8 sps:$4 sm:$0xff]   ;;  %v1538_v21 = vld [vmem:[%s1916_s29 + $0x94] ss:$8 sps:$4 sm:$0xff]   ;;  %v1541_v23 = vld [vmem:[%s1916_s29 + $0x90] ss:$8 sps:$4 sm:$0xff]   ;;  %p1639_p8 = pneg %p1638_p6 }
  0x63   : > { %785 = vmatprep.mubr.bf16.mxu1 %v1535_v12  ;;  %v1533_v19 = vld [vmem:[%s1916_s29 + $0x80] ss:$8 sps:$4 sm:$0xff]   ;;  %v1542_v24 = vld [vmem:[%s1916_s29 + $0x24] ss:$8 sps:$4 sm:$0xff]   ;;  %v1548_v28 = vld [vmem:[%s1916_s29 + $0x34] ss:$8 sps:$4 sm:$0xff]   ;;  %p1645_p0 = por %p1644_p11, %p1643_p12 }
  0x64   : > { %v1544_v25 = vld [vmem:[%s1916_s29 + $0xa4] ss:$8 sps:$4 sm:$0xff]   ;;  %v1546_v26 = vld [vmem:[%s1916_s29 + $0x20] ss:$8 sps:$4 sm:$0xff]   ;;  %v1550_v29 = vld [vmem:[%s1916_s29 + $0xb4] ss:$8 sps:$4 sm:$0xff]  }
  0x65   : > { %1311 = vmatpush3.bf16.msra.mxu0 %v1519_v5  ;;  %1428 = vmatpush3.bf16.msra.mxu1 %v1519_v5  ;;  %v1547_v27 = vld [vmem:[%s1916_s29 + $0xa0] ss:$8 sps:$4 sm:$0xff]   ;;  %v1552_v30 = vld [vmem:[%s1916_s29 + $0x30] ss:$8 sps:$4 sm:$0xff]   ;;  %v1554_v32 = vld [vmem:[%s1916_s29 + $0x44] ss:$8 sps:$4 sm:$0xff]   ;;  %p1646_p5 = pnand %p1645_p0, %p1639_p8 }
  0x66   : > { %1312 = vmatprep.subr.bf16.mxu0 %v1520_v6  ;;  %1421 = vmatprep.subr.bf16.mxu1 %v1520_v6  ;;  %v1553_v31 = vld [vmem:[%s1916_s29 + $0xb0] ss:$8 sps:$4 sm:$0xff]   ;;  %v1556_v33 = vld [vmem:[%s1916_s29 + $0xc4] ss:$8 sps:$4 sm:$0xff]   ;;  %v1558_v34 = vld [vmem:[%s1916_s29 + $0x40] ss:$8 sps:$4 sm:$0xff]  }
  0x67   : > { %v1559_v35 = vld [vmem:[%s1916_s29 + $0xc0] ss:$8 sps:$4 sm:$0xff]   ;;  %v1560_v36 = vld [vmem:[%s1916_s29 + $0x54] ss:$8 sps:$4 sm:$0xff]   ;;  %v1564_v38 = vld [vmem:[%s1916_s29 + $0x50] ss:$8 sps:$4 sm:$0xff]  }
  0x68   : > { %v1562_v37 = vld [vmem:[%s1916_s29 + $0xd4] ss:$8 sps:$4 sm:$0xff]   ;;  %v1565_v39 = vld [vmem:[%s1916_s29 + $0xd0] ss:$8 sps:$4 sm:$0xff]   ;;  %v1566_v40 = vld [vmem:[%s1916_s29 + $0x64] ss:$8 sps:$4 sm:$0xff]  }
  0x69   : > { %1313 = vmatpush3.bf16.msra.mxu0 %v1521_v7  ;;  %1429 = vmatpush3.bf16.msra.mxu1 %v1521_v7  ;;  %v1568_v41 = vld [vmem:[%s1916_s29 + $0xe4] ss:$8 sps:$4 sm:$0xff]   ;;  %v1570_v42 = vld [vmem:[%s1916_s29 + $0x60] ss:$8 sps:$4 sm:$0xff]   ;;  %v1572_v44 = vld [vmem:[%s1916_s29 + $0x74] ss:$8 sps:$4 sm:$0xff]  }
  0x6a   : > { %1314 = vmatprep.subr.bf16.mxu0 %v1522_v8  ;;  %1422 = vmatprep.subr.bf16.mxu1 %v1522_v8  ;;  %v1571_v43 = vld [vmem:[%s1916_s29 + $0xe0] ss:$8 sps:$4 sm:$0xff]   ;;  %v1574_v45 = vld [vmem:[%s1916_s29 + $0xf4] ss:$8 sps:$4 sm:$0xff]   ;;  %v1576_v46 = vld [vmem:[%s1916_s29 + $0x70] ss:$8 sps:$4 sm:$0xff]  }
  0x6b   : > { %v1577_v47 = vld [vmem:[%s1916_s29 + $0xf0] ss:$8 sps:$4 sm:$0xff]   ;;  %v1961_v56 = vld [vmem:[%s2126_s2] ss:$0 sm:$0xff] }
  0x6c   : > { %v1966_v61 = vld [vmem:[%s2127_s3] ss:$0 sm:$0xff] }
  0x6d   : > { %1315 = vmatpush3.bf16.msra.mxu0 %v1523_v9  ;;  %1430 = vmatpush3.bf16.msra.mxu1 %v1523_v9 }
  0x6e   : > { %1316 = vmatprep.subr.bf16.mxu0 %v1524_v10  ;;  %1423 = vmatprep.subr.bf16.mxu1 %v1524_v10 }
  0x71   : > { %1317 = vmatpush3.bf16.msra.mxu0 %v1525_v13  ;;  %1431 = vmatpush3.bf16.msra.mxu1 %v1525_v13 }
  0x72   : > { %1318 = vmatprep.subr.bf16.mxu0 %v1526_v14  ;;  %1424 = vmatprep.subr.bf16.mxu1 %v1526_v14 }
  0x75   : > { %1319 = vmatpush3.bf16.msra.mxu0 %v1527_v15  ;;  %1432 = vmatpush3.bf16.msra.mxu1 %v1527_v15 }
  0x76   : > { %1320 = vmatprep.subr.bf16.mxu0 %v1528_v16  ;;  %1425 = vmatprep.subr.bf16.mxu1 %v1528_v16 }
  0x79   : > { %1321 = vmatpush3.bf16.msra.mxu0 %v1529_v17  ;;  %1433 = vmatpush3.bf16.msra.mxu1 %v1529_v17 }
  0x7c   : > { %722 = vmatmul.mubr.bf16.vlgmr.msra.gmra.mrb[0].mxu0 %v1530_v18  ;;  %786 = vmatmul.mubr.bf16.vlgmr.msra.gmra.mrb[0].mxu1 %v1533_v19 }
  0x7d   : > { %729 = vmatprep.mubr.bf16.mxu0 %v1536_v20  ;;  %793 = vmatprep.mubr.bf16.mxu1 %v1538_v21 }
  0x84   : > { %730 = vmatmul.mubr.bf16.gmra.mrb[4].mxu0 %v1540_v22  ;;  %794 = vmatmul.mubr.bf16.gmra.mrb[4].mxu1 %v1541_v23 }
  0x85   : > { %737 = vmatprep.mubr.bf16.mxu0 %v1542_v24  ;;  %801 = vmatprep.mubr.bf16.mxu1 %v1544_v25 }
  0x8c   : > { %738 = vmatmul.mubr.bf16.gmra.mrb[8].mxu0 %v1546_v26  ;;  %802 = vmatmul.mubr.bf16.gmra.mrb[8].mxu1 %v1547_v27 }
  0x8d   : > { %745 = vmatprep.mubr.bf16.mxu0 %v1548_v28  ;;  %809 = vmatprep.mubr.bf16.mxu1 %v1550_v29 }
  0x94   : > { %746 = vmatmul.mubr.bf16.gmra.mrb[12].mxu0 %v1552_v30  ;;  %810 = vmatmul.mubr.bf16.gmra.mrb[12].mxu1 %v1553_v31 }
  0x95   : > { %753 = vmatprep.mubr.bf16.mxu0 %v1554_v32  ;;  %817 = vmatprep.mubr.bf16.mxu1 %v1556_v33 }
  0x9c   : > { %754 = vmatmul.mubr.bf16.gmra.mrb[16].mxu0 %v1558_v34  ;;  %818 = vmatmul.mubr.bf16.gmra.mrb[16].mxu1 %v1559_v35 }
  0x9d   : > { %761 = vmatprep.mubr.bf16.mxu0 %v1560_v36  ;;  %825 = vmatprep.mubr.bf16.mxu1 %v1562_v37 }
  0xa4   : > { %762 = vmatmul.mubr.bf16.gmra.mrb[20].mxu0 %v1564_v38  ;;  %826 = vmatmul.mubr.bf16.gmra.mrb[20].mxu1 %v1565_v39 }
  0xa5   : > { %769 = vmatprep.mubr.bf16.mxu0 %v1566_v40  ;;  %833 = vmatprep.mubr.bf16.mxu1 %v1568_v41 }
  0xac   : > { %770 = vmatmul.mubr.bf16.gmra.mrb[24].mxu0 %v1570_v42  ;;  %834 = vmatmul.mubr.bf16.gmra.mrb[24].mxu1 %v1571_v43 }
  0xad   : > { %777 = vmatprep.mubr.bf16.mxu0 %v1572_v44  ;;  %841 = vmatprep.mubr.bf16.mxu1 %v1574_v45 }
  0xb4   : > { %778 = vmatmul.mubr.bf16.gmra.mrb[28].mxu0 %v1576_v46  ;;  %842 = vmatmul.mubr.bf16.gmra.mrb[28].mxu1 %v1577_v47 }
 0x14f   : > { %v1322_v48 = vpop.f32.mrb[0].mxu0  ;;  %v1370_v49 = vpop.f32.mrb[0].mxu1 }
 0x150   : > { %v1323_v50 = vpop.f32.mrb[1].mxu0  ;;  %v1371_v51 = vpop.f32.mrb[1].mxu1 }
 0x151   : > { %v1324_v52 = vadd.f32 %v1323_v50, %v1322_v48  ;;  %v1372_v53 = vadd.f32 %v1371_v51, %v1370_v49  ;;  %v1325_v54 = vpop.f32.mrb[2].mxu0  ;;  %v1373_v55 = vpop.f32.mrb[2].mxu1 }
 0x152   : > { %v1326_v57 = vpop.f32.mrb[3].mxu0  ;;  %v1374_v58 = vpop.f32.mrb[3].mxu1 }
 0x153   : > { %v1327_v59 = vadd.f32 %v1326_v57, %v1325_v54  ;;  %v1375_v60 = vadd.f32 %v1374_v58, %v1373_v55  ;;  %v956_v62 = vmul.f32 %v1324_v52, %v1961_v56  ;;  %v972_v63 = vmul.f32 %v1372_v53, %v1961_v56 }
 0x155   : > { %v995_v0 = vadd.f32 %v1966_v61, %v956_v62  ;;  %v1011_v1 = vadd.f32 %v1966_v61, %v972_v63  ;;  %v957_v2 = vmul.f32 %v1327_v59, %v1961_v56  ;;  %v973_v3 = vmul.f32 %v1375_v60, %v1961_v56 }
 0x157   : > { %v1328_v4 = vpop.f32.mrb[4].mxu0  ;;  %v1376_v5 = vpop.f32.mrb[4].mxu1  ;;  %v1027_v8 = vmax.f32 %v995_v0, 0.0  ;;  %v1043_v9 = vmax.f32 %v1011_v1, 0.0  ;;  %v996_v10 = vadd.f32 %v1966_v61, %v957_v2  ;;  %v1012_v11 = vadd.f32 %v1966_v61, %v973_v3 }
 0x158   : > { %v1329_v6 = vpop.f32.mrb[5].mxu0  ;;  %v1377_v7 = vpop.f32.mrb[5].mxu1 }
 0x159   : > { %v1331_v12 = vpop.f32.mrb[6].mxu0  ;;  %v1379_v13 = vpop.f32.mrb[6].mxu1  ;;  %v1330_v14 = vadd.f32 %v1329_v6, %v1328_v4  ;;  %v1378_v15 = vadd.f32 %v1377_v7, %v1376_v5  ;;  %1059 = vst [vmem:[%s1978_s21] sm:$0xff] %v1027_v8  ;;  %1075 = vst [vmem:[%s1978_s21 + $0x80] sm:$0xff] %v1043_v9  ;;  %v1028_v18 = vmax.f32 %v996_v10, 0.0  ;;  %v1044_v19 = vmax.f32 %v1012_v11, 0.0 }
 0x15a   : > { %v1332_v16 = vpop.f32.mrb[7].mxu0  ;;  %v1380_v17 = vpop.f32.mrb[7].mxu1 }
 0x15b   : > { %v1333_v20 = vadd.f32 %v1332_v16, %v1331_v12  ;;  %v1381_v21 = vadd.f32 %v1380_v17, %v1379_v13  ;;  %1060 = vst [vmem:[%s1978_s21 + $0x8] sm:$0xff] %v1028_v18  ;;  %1076 = vst [vmem:[%s1978_s21 + $0x88] sm:$0xff] %v1044_v19  ;;  %v958_v22 = vmul.f32 %v1330_v14, %v1961_v56 }
 0x15c   : > { %v974_v23 = vmul.f32 %v1378_v15, %v1961_v56 }
 0x15d   : > { %v959_v24 = vmul.f32 %v1333_v20, %v1961_v56  ;;  %v975_v25 = vmul.f32 %v1381_v21, %v1961_v56  ;;  %v997_v28 = vadd.f32 %v1966_v61, %v958_v22 }
 0x15e   : > { %v1013_v29 = vadd.f32 %v1966_v61, %v974_v23 }
 0x15f   : > { %v1334_v26 = vpop.f32.mrb[8].mxu0  ;;  %v1382_v27 = vpop.f32.mrb[8].mxu1  ;;  %v998_v32 = vadd.f32 %v1966_v61, %v959_v24  ;;  %v1014_v33 = vadd.f32 %v1966_v61, %v975_v25  ;;  %v1029_v38 = vmax.f32 %v997_v28, 0.0 }
 0x160   : > { %v1335_v30 = vpop.f32.mrb[9].mxu0  ;;  %v1383_v31 = vpop.f32.mrb[9].mxu1  ;;  %v1045_v39 = vmax.f32 %v1013_v29, 0.0 }
 0x161   : > { %v1336_v34 = vadd.f32 %v1335_v30, %v1334_v26  ;;  %v1384_v35 = vadd.f32 %v1383_v31, %v1382_v27  ;;  %v1337_v36 = vpop.f32.mrb[10].mxu0  ;;  %v1385_v37 = vpop.f32.mrb[10].mxu1  ;;  %v1030_v42 = vmax.f32 %v998_v32, 0.0  ;;  %v1046_v43 = vmax.f32 %v1014_v33, 0.0  ;;  %1061 = vst [vmem:[%s1978_s21 + $0x10] sm:$0xff] %v1029_v38 }
 0x162   : > { %v1338_v40 = vpop.f32.mrb[11].mxu0  ;;  %v1386_v41 = vpop.f32.mrb[11].mxu1  ;;  %1077 = vst [vmem:[%s1978_s21 + $0x90] sm:$0xff] %v1045_v39 }
 0x163   : > { %v1339_v44 = vadd.f32 %v1338_v40, %v1337_v36  ;;  %v1387_v45 = vadd.f32 %v1386_v41, %v1385_v37  ;;  %1062 = vst [vmem:[%s1978_s21 + $0x18] sm:$0xff] %v1030_v42  ;;  %1078 = vst [vmem:[%s1978_s21 + $0x98] sm:$0xff] %v1046_v43  ;;  %v960_v46 = vmul.f32 %v1336_v34, %v1961_v56 }
 0x164   : > { %v976_v47 = vmul.f32 %v1384_v35, %v1961_v56 }
 0x165   : > { %v999_v48 = vadd.f32 %v1966_v61, %v960_v46  ;;  %v961_v52 = vmul.f32 %v1339_v44, %v1961_v56  ;;  %v977_v53 = vmul.f32 %v1387_v45, %v1961_v56 }
 0x166   : > { %v1015_v49 = vadd.f32 %v1966_v61, %v976_v47 }
 0x167   : > { %v1340_v50 = vpop.f32.mrb[12].mxu0  ;;  %v1388_v51 = vpop.f32.mrb[12].mxu1  ;;  %v1031_v57 = vmax.f32 %v999_v48, 0.0  ;;  %v1000_v0 = vadd.f32 %v1966_v61, %v961_v52  ;;  %v1016_v1 = vadd.f32 %v1966_v61, %v977_v53 }
 0x168   : > { %v1341_v54 = vpop.f32.mrb[13].mxu0  ;;  %v1389_v55 = vpop.f32.mrb[13].mxu1  ;;  %v1047_v58 = vmax.f32 %v1015_v49, 0.0 }
 0x169   : > { %v1342_v59 = vadd.f32 %v1341_v54, %v1340_v50  ;;  %v1390_v60 = vadd.f32 %v1389_v55, %v1388_v51  ;;  %v1343_v62 = vpop.f32.mrb[14].mxu0  ;;  %v1391_v63 = vpop.f32.mrb[14].mxu1  ;;  %1063 = vst [vmem:[%s1978_s21 + $0x20] sm:$0xff] %v1031_v57  ;;  %v1032_v6 = vmax.f32 %v1000_v0, 0.0  ;;  %v1048_v7 = vmax.f32 %v1016_v1, 0.0 }
 0x16a   : > { %v1344_v2 = vpop.f32.mrb[15].mxu0  ;;  %v1392_v3 = vpop.f32.mrb[15].mxu1  ;;  %1079 = vst [vmem:[%s1978_s21 + $0xa0] sm:$0xff] %v1047_v58 }
 0x16b   : > { %v1345_v4 = vadd.f32 %v1344_v2, %v1343_v62  ;;  %v1393_v5 = vadd.f32 %v1392_v3, %v1391_v63  ;;  %v962_v8 = vmul.f32 %v1342_v59, %v1961_v56  ;;  %v978_v9 = vmul.f32 %v1390_v60, %v1961_v56  ;;  %1064 = vst [vmem:[%s1978_s21 + $0x28] sm:$0xff] %v1032_v6 }
 0x16c   : > { %1080 = vst [vmem:[%s1978_s21 + $0xa8] sm:$0xff] %v1048_v7 }
 0x16d   : > { %v1001_v10 = vadd.f32 %v1966_v61, %v962_v8  ;;  %v1017_v11 = vadd.f32 %v1966_v61, %v978_v9  ;;  %v963_v12 = vmul.f32 %v1345_v4, %v1961_v56  ;;  %v979_v13 = vmul.f32 %v1393_v5, %v1961_v56 }
 0x16f   : > { %v1346_v14 = vpop.f32.mrb[16].mxu0  ;;  %v1394_v15 = vpop.f32.mrb[16].mxu1  ;;  %v1033_v18 = vmax.f32 %v1001_v10, 0.0  ;;  %v1049_v19 = vmax.f32 %v1017_v11, 0.0  ;;  %v1002_v20 = vadd.f32 %v1966_v61, %v963_v12  ;;  %v1018_v21 = vadd.f32 %v1966_v61, %v979_v13 }
 0x170   : > { %v1347_v16 = vpop.f32.mrb[17].mxu0  ;;  %v1395_v17 = vpop.f32.mrb[17].mxu1 }
 0x171   : > { %v1349_v22 = vpop.f32.mrb[18].mxu0  ;;  %v1397_v23 = vpop.f32.mrb[18].mxu1  ;;  %v1348_v24 = vadd.f32 %v1347_v16, %v1346_v14  ;;  %v1396_v25 = vadd.f32 %v1395_v17, %v1394_v15  ;;  %1065 = vst [vmem:[%s1978_s21 + $0x30] sm:$0xff] %v1033_v18  ;;  %1081 = vst [vmem:[%s1978_s21 + $0xb0] sm:$0xff] %v1049_v19  ;;  %v1034_v28 = vmax.f32 %v1002_v20, 0.0  ;;  %v1050_v29 = vmax.f32 %v1018_v21, 0.0 }
 0x172   : > { %v1350_v26 = vpop.f32.mrb[19].mxu0  ;;  %v1398_v27 = vpop.f32.mrb[19].mxu1 }
 0x173   : > { %v1351_v30 = vadd.f32 %v1350_v26, %v1349_v22  ;;  %v1399_v31 = vadd.f32 %v1398_v27, %v1397_v23  ;;  %1066 = vst [vmem:[%s1978_s21 + $0x38] sm:$0xff] %v1034_v28  ;;  %1082 = vst [vmem:[%s1978_s21 + $0xb8] sm:$0xff] %v1050_v29  ;;  %v964_v32 = vmul.f32 %v1348_v24, %v1961_v56 }
 0x174   : > { %v980_v33 = vmul.f32 %v1396_v25, %v1961_v56 }
 0x175   : > { %v965_v34 = vmul.f32 %v1351_v30, %v1961_v56  ;;  %v981_v35 = vmul.f32 %v1399_v31, %v1961_v56  ;;  %v1003_v38 = vadd.f32 %v1966_v61, %v964_v32 }
 0x176   : > { %v1019_v39 = vadd.f32 %v1966_v61, %v980_v33 }
 0x177   : > { %v1352_v36 = vpop.f32.mrb[20].mxu0  ;;  %v1400_v37 = vpop.f32.mrb[20].mxu1  ;;  %v1004_v42 = vadd.f32 %v1966_v61, %v965_v34  ;;  %v1020_v43 = vadd.f32 %v1966_v61, %v981_v35  ;;  %v1035_v48 = vmax.f32 %v1003_v38, 0.0 }
 0x178   : > { %v1353_v40 = vpop.f32.mrb[21].mxu0  ;;  %v1401_v41 = vpop.f32.mrb[21].mxu1  ;;  %v1051_v49 = vmax.f32 %v1019_v39, 0.0 }
 0x179   : > { %v1354_v44 = vadd.f32 %v1353_v40, %v1352_v36  ;;  %v1402_v45 = vadd.f32 %v1401_v41, %v1400_v37  ;;  %v1355_v46 = vpop.f32.mrb[22].mxu0  ;;  %v1403_v47 = vpop.f32.mrb[22].mxu1  ;;  %v1036_v52 = vmax.f32 %v1004_v42, 0.0  ;;  %v1052_v53 = vmax.f32 %v1020_v43, 0.0  ;;  %1067 = vst [vmem:[%s1978_s21 + $0x40] sm:$0xff] %v1035_v48 }
 0x17a   : > { %v1356_v50 = vpop.f32.mrb[23].mxu0  ;;  %v1404_v51 = vpop.f32.mrb[23].mxu1  ;;  %1083 = vst [vmem:[%s1978_s21 + $0xc0] sm:$0xff] %v1051_v49 }
 0x17b   : > { %v1357_v54 = vadd.f32 %v1356_v50, %v1355_v46  ;;  %v1405_v55 = vadd.f32 %v1404_v51, %v1403_v47  ;;  %1068 = vst [vmem:[%s1978_s21 + $0x48] sm:$0xff] %v1036_v52  ;;  %1084 = vst [vmem:[%s1978_s21 + $0xc8] sm:$0xff] %v1052_v53  ;;  %v966_v57 = vmul.f32 %v1354_v44, %v1961_v56 }
 0x17c   : > { %v982_v58 = vmul.f32 %v1402_v45, %v1961_v56 }
 0x17d   : > { %v1005_v59 = vadd.f32 %v1966_v61, %v966_v57  ;;  %v967_v0 = vmul.f32 %v1357_v54, %v1961_v56  ;;  %v983_v1 = vmul.f32 %v1405_v55, %v1961_v56 }
 0x17e   : > { %v1021_v60 = vadd.f32 %v1966_v61, %v982_v58 }
 0x17f   : > { %v1358_v62 = vpop.f32.mrb[24].mxu0  ;;  %v1406_v63 = vpop.f32.mrb[24].mxu1  ;;  %v1037_v4 = vmax.f32 %v1005_v59, 0.0  ;;  %v1006_v10 = vadd.f32 %v1966_v61, %v967_v0  ;;  %v1022_v11 = vadd.f32 %v1966_v61, %v983_v1 }
 0x180   : > { %v1359_v2 = vpop.f32.mrb[25].mxu0  ;;  %v1407_v3 = vpop.f32.mrb[25].mxu1  ;;  %v1053_v5 = vmax.f32 %v1021_v60, 0.0 }
 0x181   : > { %v1360_v6 = vadd.f32 %v1359_v2, %v1358_v62  ;;  %v1408_v7 = vadd.f32 %v1407_v3, %v1406_v63  ;;  %v1361_v8 = vpop.f32.mrb[26].mxu0  ;;  %v1409_v9 = vpop.f32.mrb[26].mxu1  ;;  %1069 = vst [vmem:[%s1978_s21 + $0x50] sm:$0xff] %v1037_v4  ;;  %v1038_v16 = vmax.f32 %v1006_v10, 0.0  ;;  %v1054_v17 = vmax.f32 %v1022_v11, 0.0 }
 0x182   : > { %v1362_v12 = vpop.f32.mrb[27].mxu0  ;;  %v1410_v13 = vpop.f32.mrb[27].mxu1  ;;  %1085 = vst [vmem:[%s1978_s21 + $0xd0] sm:$0xff] %v1053_v5 }
 0x183   : > { %v1363_v14 = vadd.f32 %v1362_v12, %v1361_v8  ;;  %v1411_v15 = vadd.f32 %v1410_v13, %v1409_v9  ;;  %v968_v18 = vmul.f32 %v1360_v6, %v1961_v56  ;;  %v984_v19 = vmul.f32 %v1408_v7, %v1961_v56  ;;  %1070 = vst [vmem:[%s1978_s21 + $0x58] sm:$0xff] %v1038_v16 }
 0x184   : > { %1086 = vst [vmem:[%s1978_s21 + $0xd8] sm:$0xff] %v1054_v17 }
 0x185   : > { %v1007_v20 = vadd.f32 %v1966_v61, %v968_v18  ;;  %v1023_v21 = vadd.f32 %v1966_v61, %v984_v19  ;;  %v969_v22 = vmul.f32 %v1363_v14, %v1961_v56  ;;  %v985_v23 = vmul.f32 %v1411_v15, %v1961_v56 }
 0x187   : > { %v1364_v24 = vpop.f32.mrb[28].mxu0  ;;  %v1412_v25 = vpop.f32.mrb[28].mxu1  ;;  %v1039_v28 = vmax.f32 %v1007_v20, 0.0  ;;  %v1055_v29 = vmax.f32 %v1023_v21, 0.0  ;;  %v1008_v30 = vadd.f32 %v1966_v61, %v969_v22  ;;  %v1024_v31 = vadd.f32 %v1966_v61, %v985_v23 }
 0x188   : > { %v1365_v26 = vpop.f32.mrb[29].mxu0  ;;  %v1413_v27 = vpop.f32.mrb[29].mxu1 }
 0x189   : > { %v1367_v32 = vpop.f32.mrb[30].mxu0  ;;  %v1415_v33 = vpop.f32.mrb[30].mxu1  ;;  %v1366_v34 = vadd.f32 %v1365_v26, %v1364_v24  ;;  %v1414_v35 = vadd.f32 %v1413_v27, %v1412_v25  ;;  %1071 = vst [vmem:[%s1978_s21 + $0x60] sm:$0xff] %v1039_v28  ;;  %1087 = vst [vmem:[%s1978_s21 + $0xe0] sm:$0xff] %v1055_v29  ;;  %v1040_v38 = vmax.f32 %v1008_v30, 0.0  ;;  %v1056_v39 = vmax.f32 %v1024_v31, 0.0 }
 0x18a   : > { %v1368_v36 = vpop.f32.mrb[31].mxu0  ;;  %v1416_v37 = vpop.f32.mrb[31].mxu1 }
 0x18b   : > { %v1369_v40 = vadd.f32 %v1368_v36, %v1367_v32  ;;  %v1417_v41 = vadd.f32 %v1416_v37, %v1415_v33  ;;  %1072 = vst [vmem:[%s1978_s21 + $0x68] sm:$0xff] %v1040_v38  ;;  %1088 = vst [vmem:[%s1978_s21 + $0xe8] sm:$0xff] %v1056_v39  ;;  %v970_v42 = vmul.f32 %v1366_v34, %v1961_v56 }
 0x18c   : > { %v986_v43 = vmul.f32 %v1414_v35, %v1961_v56 }
 0x18d   : > { %v971_v44 = vmul.f32 %v1369_v40, %v1961_v56  ;;  %v987_v45 = vmul.f32 %v1417_v41, %v1961_v56  ;;  %v1009_v46 = vadd.f32 %v1966_v61, %v970_v42 }
 0x18e   : > { %v1025_v47 = vadd.f32 %v1966_v61, %v986_v43 }
 0x18f   : > { %v1010_v48 = vadd.f32 %v1966_v61, %v971_v44  ;;  %v1026_v49 = vadd.f32 %v1966_v61, %v987_v45  ;;  %v1041_v50 = vmax.f32 %v1009_v46, 0.0 }
 0x190   : > { %v1057_v51 = vmax.f32 %v1025_v47, 0.0 }
 0x191   : > { %v1042_v56 = vmax.f32 %v1010_v48, 0.0  ;;  %v1058_v52 = vmax.f32 %v1026_v49, 0.0  ;;  %1073 = vst [vmem:[%s1978_s21 + $0x70] sm:$0xff] %v1041_v50 }
 0x192   : > { %1089 = vst [vmem:[%s1978_s21 + $0xf0] sm:$0xff] %v1057_v51 }
 0x193   : > { %1074 = vst [vmem:[%s1978_s21 + $0x78] sm:$0xff] %v1042_v56  ;;  %1090 = vst [vmem:[%s1978_s21 + $0xf8] sm:$0xff] %v1058_v52 }
 0x194   : > { %1649 = shalt.err (!%p1646_p5)
}
 0x195   : > { %s1650_s29 = scalar_lea.hbm %s2069_s30, 4096  ;;  %s1654_s27 = scalar_lea.hbm %s2128_s4, 8192 }
 0x196   : > { %p1651_p9 = scmp.ne.s32.totalorder %s2069_s30, %s1650_s29  ;;  %p1655_p3 = scmp.lt.u32.totalorder %s2069_s30, %s2128_s4 }
 0x197   : > { %p1656_p7 = scmp.lt.u32.totalorder %s1654_s27, %s1650_s29  ;;  %p1658_p4 = scmp.lt.u32.totalorder %s1650_s29, %s2069_s30 }
 0x198   : > { %p1652_p1 = pnand %p1651_p9, %p1854_p10 }
 0x199   : > { %p1657_p13 = por %p1656_p7, %p1655_p3 }
 0x19a   : > { %p1653_p2 = pneg %p1652_p1 }
 0x19b   : > { %p1659_p6 = por %p1658_p4, %p1657_p13 }
 0x19d   : > { %p1660_p8 = pnand %p1659_p6, %p1653_p2 }
 0x19f   : > { %1663 = shalt.err (!%p1660_p8)
}
 0x1a0   : > { %s1731_s22 = smov 128   ;;  %s1732_s13 = smov 8  }
 0x1a1   : > { %1440 = dma.vmem_to_hbm [thread:$0]  (%p1854_p10), %s2071_s28, 4096, %s2069_s30, %s1092_s18, %s1731_s22, %s1731_s22, %s1732_s13  }
 0x1a2 PF: > { %s1121_s24 = sand.u32 1, %s1702_s15   ;;  %p2146_p12 = scmp.ne.s32.totalorder %s2136_s26, 0 }
 0x1a3   : > { %p2147_p11 = scmp.ge.s32.totalorder %s1722_s20, 2  ;;  %s1122_s6 = scalar_lea.sflag [#allocation4], %s1121_s24 }
 0x1a5   : > { %p1451_p0 = pnand %p2147_p11, %p2146_p12 }
 0x1a7   : > { %1697 = dma.done.wait (!%p1451_p0), %s1122_s6, 4096  }
 0x1a8   : > { %1699 = vsyncadd (!%p1451_p0), %s1122_s6, 4294963200  ;;  %s21_s20 = sadd.s32 1, %s1722_s20   ;;  %s2148_s15 = smov %s1706_s16 }
 0x1a9   : > { %p18_p5 = scmp.ge.s32.totalorder %s21_s20, 4   ;;  %s2149_s16 = smov %s1710_s17 }
 0x1aa   : > { %s2150_s17 = smov %s1863_s10  ;;  %s2151_s18 = smov %s1718_s19 }
 0x1ab   : > { %s2152_s19 = smov %s2154_s5  ;;  %20 = sbr.rel (!%p18_p5) target bundleno = 7 (0x7), region = 100 }
 0x1b2   :  { %1127 = vsyncpa [#allocation3], 1 }
 0x1b3   :  { %1129 = vsyncpa [#allocation3 + $0x1], 1 }
 0x1b4   :  { %1130 = vsyncpa [#allocation6], 1 }
 0x1b5   :  { %1131 = vsyncpa [#allocation4], 1 }
 0x1b6   :  { %1133 = vsyncpa [#allocation4 + $0x1], 1 }

</bundles_post_ra>
